<compile_context>
chip_gen: v7x
topology: tpu7x:2x2x1
jax: 0.10.0
libtpu: 0.0.40
codegen_flags: <defaults>
</compile_context>

<pallas_src>
import jax
import jax.numpy as jnp
from jax import lax
from jax.experimental import pallas as pl
from jax.experimental.pallas import tpu as pltpu


def _softargmax_kernel(x_ref, o_ref):
    # x_ref block: (NB, C, T).  Argmax one-hot along channel axis (axis=1),
    # first max wins on ties (matches torch.max tie-breaking).
    x = x_ref[...]  # native dtype; comparisons are exact, no upcast needed
    m = jnp.max(x, axis=1, keepdims=True)
    is_max = x == m
    c_iota = lax.broadcasted_iota(jnp.int32, x.shape, 1)
    big = jnp.iinfo(jnp.int32).max
    idx = jnp.min(jnp.where(is_max, c_iota, big), axis=1, keepdims=True)
    o_ref[...] = (c_iota == idx).astype(o_ref.dtype)


# ~4 MiB input block: >=85% of HBM roofline on all generations, and
# 2 buffers x (in + out) x 4 MiB = 16 MiB pipeline footprint fits v7x's 64 MiB
# physical VMEM with headroom under the 32 MiB scoped limit.
_BLOCK_BYTES = 4 * 1024 * 1024
_VMEM_LIMIT_BYTES = 32 * 1024 * 1024
_MIN_GRID_STEPS = 8  # keep megacore / double-buffering fed when batch allows


def softargmax(logits, num_cls):
    """Pallas implementation of Softargmax.forward (returns `ret`, NCHW)."""
    N, C, H, W = logits.shape
    assert C == num_cls
    HW = H * W
    itemsize = jnp.dtype(logits.dtype).itemsize
    row_bytes = C * HW * itemsize  # one batch row, contiguous in memory

    x = logits.reshape(N, C, HW)

    if row_bytes <= _BLOCK_BYTES:
        # Whole (C, HW) rows fit: block NB batch rows per step so each DMA is a
        # single contiguous region (no strided segments), while keeping enough
        # grid steps for megacore sharding + pipelining.
        nb = max(1, min(N, _BLOCK_BYTES // row_bytes, pl.cdiv(N, _MIN_GRID_STEPS)))
        grid = (pl.cdiv(N, nb),)
        in_specs = [pl.BlockSpec((nb, C, HW), lambda n: (n, 0, 0))]
        out_specs = pl.BlockSpec((nb, C, HW), lambda n: (n, 0, 0))
        dim_sem = ("parallel",)
    else:
        # Row too big for one block: tile the spatial axis lane-dense.  The
        # ragged tail block (HW % hw_tile != 0) is masked by Pallas — no
        # wrapper-side pad or slice.
        hw_tile = max(128, (_BLOCK_BYTES // (C * itemsize)) // 128 * 128)
        grid = (N, pl.cdiv(HW, hw_tile))
        in_specs = [pl.BlockSpec((1, C, hw_tile), lambda n, s: (n, 0, s))]
        out_specs = pl.BlockSpec((1, C, hw_tile), lambda n, s: (n, 0, s))
        dim_sem = ("parallel", "parallel")

    out = pl.pallas_call(
        _softargmax_kernel,
        out_shape=jax.ShapeDtypeStruct((N, C, HW), logits.dtype),
        grid=grid,
        in_specs=in_specs,
        out_specs=out_specs,
        compiler_params=pltpu.CompilerParams(
            dimension_semantics=dim_sem,
            vmem_limit_bytes=_VMEM_LIMIT_BYTES,
        ),
    )(x)

    return out.reshape(N, C, H, W)


def _reference(logits):
    # pure-JAX reference of the PyTorch forward
    y_soft = jax.nn.softmax(logits, axis=1)
    idx = jnp.argmax(y_soft, axis=1, keepdims=True)
    c_iota = lax.broadcasted_iota(jnp.int32, logits.shape, 1)
    y_hard = (c_iota == idx).astype(logits.dtype)
    return y_hard - y_soft + y_soft


if __name__ == "__main__":
    key = jax.random.PRNGKey(0)
    N, C, H, W = 2, 4, 16, 16  # num_cls = 4
    logits = jax.random.normal(key, (N, C, H, W), dtype=jnp.float32)

    out = softargmax(logits, num_cls=C)
    out = jax.block_until_ready(out)

    ref = _reference(logits)
    assert out.shape == (N, C, H, W)
    assert out.dtype == logits.dtype
    assert jnp.allclose(out, ref, atol=1e-5), "mismatch vs reference"
    # each spatial location holds a one-hot vector over channels
    assert jnp.allclose(jnp.sum(out, axis=1), 1.0, atol=1e-5)
    assert jnp.allclose(jnp.max(out, axis=1), 1.0, atol=1e-5)

    print("KERNEL_OK")
</pallas_src>

<mosaic_0001>
module attributes {stable_mosaic.version = 11 : i64} {
  func.func @_softargmax_kernel(%arg0: i32, %arg1: memref<1x4x256xf32, #tpu.memory_space<vmem>>, %arg2: memref<1x4x256xf32, #tpu.memory_space<vmem>>) attributes {dimension_semantics = [#tpu.dimension_semantics<parallel>], iteration_bounds = array<i64: 2>, scalar_prefetch = 0 : i64, scratch_operands = 0 : i64, tpu.core_type = #tpu.core_type<tc>, window_params = [{transform_indices = @transform_0, window_bounds = array<i64: 1, 4, 256>}, {transform_indices = @transform_1, window_bounds = array<i64: 1, 4, 256>}]} {
    %c0 = arith.constant 0 : index
    %c0_0 = arith.constant 0 : index
    %c0_1 = arith.constant 0 : index
    %0 = vector.load %arg1[%c0, %c0_0, %c0_1] : memref<1x4x256xf32, #tpu.memory_space<vmem>>, vector<1x4x256xf32>
    %cst = arith.constant dense<0xFF800000> : vector<1x256xf32>
    %1 = vector.multi_reduction <maximumf>, %0, %cst [1] : vector<1x4x256xf32> to vector<1x256xf32>
    %2 = vector.shape_cast %1 : vector<1x256xf32> to vector<1x1x256xf32>
    %3 = vector.broadcast %2 : vector<1x1x256xf32> to vector<1x4x256xf32>
    %4 = arith.cmpf oeq, %0, %3 : vector<1x4x256xf32>
    %5 = tpu.iota {dimensions = array<i32: 1>} : vector<1x4x256xi32>
    %c2147483647_i32 = arith.constant 2147483647 : i32
    %6 = vector.broadcast %c2147483647_i32 : i32 to vector<1x4x256xi32>
    %7 = arith.select %4, %5, %6 : vector<1x4x256xi1>, vector<1x4x256xi32>
    %cst_2 = arith.constant dense<2147483647> : vector<1x256xi32>
    %8 = vector.multi_reduction <minsi>, %7, %cst_2 [1] : vector<1x4x256xi32> to vector<1x256xi32>
    %9 = vector.shape_cast %8 : vector<1x256xi32> to vector<1x1x256xi32>
    %10 = vector.broadcast %9 : vector<1x1x256xi32> to vector<1x4x256xi32>
    %11 = arith.cmpi eq, %5, %10 : vector<1x4x256xi32>
    %12 = arith.extui %11 : vector<1x4x256xi1> to vector<1x4x256xi32>
    %13 = arith.sitofp %12 : vector<1x4x256xi32> to vector<1x4x256xf32>
    %c0_3 = arith.constant 0 : index
    %c0_4 = arith.constant 0 : index
    %c0_5 = arith.constant 0 : index
    %14 = vector.load %arg2[%c0_3, %c0_4, %c0_5] : memref<1x4x256xf32, #tpu.memory_space<vmem>>, vector<1x4x256xf32>
    tpu.vector_store %arg2[%c0_3, %c0_4, %c0_5], %13 {strides = array<i32>} : memref<1x4x256xf32, #tpu.memory_space<vmem>>, vector<1x4x256xf32>,
    return
  }
  func.func @transform_0(%arg0: i32) -> (i32, i32, i32) {
    %c0_i32 = arith.constant 0 : i32
    %c0_i32_0 = arith.constant 0 : i32
    %c0_i32_1 = arith.constant 0 : i32
    return %arg0, %c0_i32, %c0_i32_0 : i32, i32, i32
  }
  func.func @transform_1(%arg0: i32) -> (i32, i32, i32) {
    %c0_i32 = arith.constant 0 : i32
    %c0_i32_0 = arith.constant 0 : i32
    %c0_i32_1 = arith.constant 0 : i32
    return %arg0, %c0_i32, %c0_i32_0 : i32, i32, i32
  }
}

</mosaic_0001>

<bundles_post_ra>
// kernel: tpu_custom_call.1
= control target key start
LH: loop header
LB: loop body
LE: loop exit
PB: predicated region body
PF: predicated region fallthrough
CT: control target
= control target key end

     0   :  { %6 = vsyncpa [#allocation3], 0  ;;  %s632_s0 = inlined_call_operand.hbm [shape: f32[2,4,256], index: 0, kind: input, shape index: {}]   ;;  %s633_s1 = inlined_call_operand.hbm [shape: f32[2,4,256], index: 1, kind: output, shape index: {}]  }
   0x1   :  { %8 = vsyncpa [#allocation3 + $0x1], 0 }
   0x2   :  { %9 = vsyncpa [#allocation4], 0 }
   0x3   :  { %11 = vsyncpa [#allocation4 + $0x1], 0  ;;  %s463_s6 = smov 0   ;;  %s465_s7 = smov 0  }
   0x4   :  { %s467_s8 = smov 0   ;;  %s469_s9 = smov 0  }
   0x5 LB: > { %s484_s10 = sadd.s32 4294967295, %s447_s9   ;;  %s284_s11 = sadd.s32 4294967294, %s447_s9   ;;  %s447_s9 = sphi %s469_s9, %s648_s9   ;;  %s443_s8 = sphi %s467_s8, %s647_s8   ;;  %s439_s7 = sphi %s465_s7, %s646_s7   ;;  %s435_s6 = sphi %s463_s6, %s645_s6  }
   0x6   : > { %s488_s12 = sadd.s32 1, %s447_s9   ;;  %s24_s13 = sadd.s32 1, %s443_s8 }
   0x7   : > { %s21_s14 = ssub.s32 %s447_s9, %s488_s12  ;;  %p31_p0 = scmp.ne.s32.totalorder %s443_s8, %s439_s7 }
   0x8   : > { %p22_p1 = scmp.eq.s32.totalorder %s21_s14, 0  ;;  %p32_p2 = scmp.eq.s32.totalorder %s447_s9, 0 }
   0x9   : > { %p37_p3 = scmp.ne.s32.totalorder %s439_s7, %s435_s6  ;;  %p38_p4 = scmp.eq.s32.totalorder %s484_s10, 0 }
   0xa   : > { %s500_s15 = scalar_select %p22_p1, %s443_s8, %s24_s13  }
   0xb   : > { %p502_p5 = por %p32_p2, %p31_p0  ;;  %p506_p6 = por %p38_p4, %p37_p3 }
   0xc   : > { %p61_p7 = scmp.eq.s32.totalorder %s484_s10, 1  ;;  %p67_p8 = scmp.eq.s32.totalorder %s284_s11, 1 }
   0xd   : > { %p314_p10 = scmp.lt.s32.totalorder %s447_s9, 2  ;;  %s87_s20 = sand.u32 1, %s443_s8  }
   0xe   : > { %p513_p11 = por %p61_p7, %p31_p0  ;;  %p517_p12 = por %p67_p8, %p37_p3 }
   0xf   : > { %s300_s21 = sshll.u32 %s447_s9, 7  ;;  %s287_s22 = sshll.u32 %s87_s20, 3 }
  0x10   : > { %s637_s18 = scalar_select %p513_p11, 1, 0 }
  0x11   : > { %s638_s19 = scalar_select %p517_p12, 1, 0 }
  0x12   : > { %s526_s25 = scalar_lea.hbm %s632_s0, %s300_s21  ;;  %s91_s26 = scalar_lea.vmem [#allocation2], %s287_s22 }
  0x13   : > { %s99_s27 = sshll.u32 %s91_s26, 4  ;;  %p530_p13 = pnand %p314_p10, %p502_p5  ;;  %s534_s27 = int_to_ptr.vmem [resolvable:$true] %s99_s27 }
  0x14   : > { %s88_s29 = scalar_lea.sflag [#allocation3], %s87_s20  ;;  %s351_s30 = scalar_lea.hbm %s526_s25, 128 }
  0x15   : > { %p352_p2 = scmp.ne.s32.totalorder %s526_s25, %s351_s30  ;;  %p353_p3 = pneg %p530_p13 }
  0x16   : > { %s356_s4 = scalar_lea.hbm %s632_s0, 256  ;;  %p357_p5 = scmp.lt.u32.totalorder %s526_s25, %s632_s0 }
  0x17   : > { %p354_p4 = pnand %p353_p3, %p352_p2  ;;  %p358_p8 = scmp.lt.u32.totalorder %s356_s4, %s351_s30 }
  0x18   : > { %p360_p9 = scmp.lt.u32.totalorder %s351_s30, %s526_s25 }
  0x19   : > { %p355_p7 = pneg %p354_p4  ;;  %p359_p10 = por %p358_p8, %p357_p5 }
  0x1b   : > { %p361_p0 = por %p360_p9, %p359_p10 }
  0x1d   : > { %p362_p1 = pnand %p361_p0, %p355_p7 }
  0x1f   : > { %365 = shalt.err (!%p362_p1)
}
  0x20   : > { %s366_s13 = scalar_lea.vmem %s534_s27, 128  ;;  %s449_s14 = smov [#allocation2]  }
  0x21   : > { %p367_p2 = scmp.ne.s32.totalorder %s534_s27, %s366_s13  ;;  %s371_s16 = sshll.u32 %s449_s14, 4  ;;  %s372_s16 = int_to_ptr.vmem [resolvable:$false] %s371_s16 }
  0x22   : > { %s373_s20 = scalar_lea.vmem %s372_s16, 256  ;;  %p374_p11 = scmp.lt.s32.totalorder %s534_s27, %s372_s16 }
  0x23   : > { %p369_p4 = pnand %p367_p2, %p353_p3  ;;  %p375_p5 = scmp.lt.s32.totalorder %s373_s20, %s366_s13 }
  0x25   : > { %p370_p12 = pneg %p369_p4  ;;  %p376_p8 = por %p375_p5, %p374_p11 }
  0x27   : > { %p377_p9 = pnand %p376_p8, %p370_p12 }
  0x29   : > { %380 = shalt.err (!%p377_p9)
}
  0x2a   : > { %309 = dma.hbm_to_vmem [thread:$0]  (!%p530_p13), %s526_s25, 128, %s534_s27, %s88_s29  }
  0x2b   : > { %p640_p0 = scmp.lt.s32.totalorder %s447_s9, 3  ;;  %p641_p1 = scmp.ge.s32.totalorder %s447_s9, 1 }
  0x2d   : > { %p105_p3 = pnand %p641_p1, %p640_p0 }
  0x2e   : > { %s568_s21 = sand.u32 (!%p105_p3), 1, %s439_s7  }
  0x2f   : > { %108 = sbr.rel (%p105_p3) target bundleno = 108 (0x6c), region = 24  ;;  %s291_s22 = sshll.u32 (!%p105_p3), %s568_s21, 3 }
  0x30   : > { %s111_s23 = scalar_lea.sflag (!%p105_p3), [#allocation3], %s568_s21  ;;  %s114_s24 = scalar_lea.vmem (!%p105_p3), [#allocation2], %s291_s22 }
  0x36   : > { %426 = dma.done.wait (%p506_p6), %s111_s23, 128  }
  0x37   : > { %428 = vsyncadd (%p506_p6), %s111_s23, 4294967168  ;;  %vm137_vm0 = vcmask 1043456   ;;  %v133_v0 = vld [vmem:[%s114_s24] sm:$0xff]  ;;  %v157_v5 = vlaneseq  ;;  %v450_v6 = vmov 839922192   ;;  %v451_v40 = vmov 0.0  }
  0x38   : > { %v135_v1 = vcombine.high %v133_v0, %v133_v0  ;;  %v138_v2 = vsel %vm137_vm0, %v133_v0, -inf  ;;  %v160_v7 = vunpack.c.l.s4 %v450_v6  ;;  %s132_s17 = scalar_lea.vmem [#allocation5], %s291_s22  ;;  %s301_s26 = sshll.u32 %s484_s10, 7 }
  0x39   : > { %v139_v3 = vrot.slane %v138_v2, 4  ;;  %v158_v12 = vshrl.u32 %v157_v5, 7  ;;  %s214_s25 = sshll.u32 %s132_s17, 4  ;;  %s590_s29 = scalar_lea.hbm %s633_s1, %s301_s26  ;;  %s585_s25 = int_to_ptr.vmem [resolvable:$true] %s214_s25 }
  0x3a   : > { %v145_v4 = vsel %vm137_vm0, %v135_v1, -inf  ;;  %v161_v13 = vunpack.c.0.s8 %v160_v7  ;;  %s200_s30 = scalar_lea.sflag [#allocation4], %s568_s21  ;;  %s381_s2 = scalar_lea.vmem %s585_s25, 128 }
  0x3b   : > { %v140_v8 = vmax.f32 %v138_v2, %v139_v3  ;;  %v146_v9 = vrot.slane %v145_v4, 4  ;;  %p382_p6 = scmp.ne.s32.totalorder %s585_s25, %s381_s2  ;;  %p642_p11 = scmp.ne.s32.totalorder %s637_s18, 0 }
  0x3c   : > { %v164_v18 = vsub.s32 %v161_v13, %v158_v12  ;;  %s452_s10 = smov [#allocation5]  }
  0x3d   : > { %v141_v10 = vrot.slane %v140_v8, 2  ;;  %v147_v11 = vmax.f32 %v145_v4, %v146_v9  ;;  %p383_p12 = pnand %p382_p6, %p642_p11  ;;  %s385_s3 = sshll.u32 %s452_s10, 4  ;;  %s386_s3 = int_to_ptr.vmem [resolvable:$false] %s385_s3 }
  0x3e   : > { %v165_v22 = vrot.slane %v158_v12, %v164_v18  ;;  %s387_s4 = scalar_lea.vmem %s386_s3, 256  ;;  %p388_p7 = scmp.lt.s32.totalorder %s585_s25, %s386_s3 }
  0x3f   : > { %v142_v14 = vmax.f32 %v140_v8, %v141_v10  ;;  %v148_v15 = vrot.slane %v147_v11, 2  ;;  %p384_p13 = pneg %p383_p12  ;;  %p389_p10 = scmp.lt.s32.totalorder %s387_s4, %s381_s2 }
  0x41   : > { %v143_v16 = vrot.slane %v142_v14, 1  ;;  %v149_v17 = vmax.f32 %v147_v11, %v148_v15  ;;  %p390_p2 = por %p389_p10, %p388_p7 }
  0x43   : > { %v144_v19 = vmax.f32 %v142_v14, %v143_v16  ;;  %v150_v20 = vrot.slane %v149_v17, 1  ;;  %p391_p4 = pnand %p390_p2, %p384_p13 }
  0x45   : > { %v151_v21 = vmax.f32 %v149_v17, %v150_v20 }
  0x47   : > { %v154_v23 = vcombine.low %v144_v19, %v151_v21 }
  0x49   : > { %vm156_vm1 = vcmp.eq.f32.partialorder %v133_v0, %v154_v23 }
  0x4a   : > { %v166_v24 = vsel %vm156_vm1, %v165_v22, 2147483647 }
  0x4b   : > { %v167_v25 = vcombine.high %v166_v24, %v166_v24  ;;  %v168_v26 = vsel %vm137_vm0, %v166_v24, 2147483647 }
  0x4c   : > { %v169_v27 = vrot.slane %v168_v26, 4 }
  0x4d   : > { %v178_v28 = vsel %vm137_vm0, %v167_v25, 2147483647 }
  0x4e   : > { %vm170_vm2 = vcmp.lt.s32.totalorder %v168_v26, %v169_v27  ;;  %v179_v29 = vrot.slane %v178_v28, 4 }
  0x4f   : > { %v171_v30 = vsel %vm170_vm2, %v168_v26, %v169_v27 }
  0x50   : > { %v172_v31 = vrot.slane %v171_v30, 2  ;;  %vm180_vm3 = vcmp.lt.s32.totalorder %v178_v28, %v179_v29 }
  0x51   : > { %v181_v32 = vsel %vm180_vm3, %v178_v28, %v179_v29 }
  0x52   : > { %vm173_vm4 = vcmp.lt.s32.totalorder %v171_v30, %v172_v31  ;;  %v182_v33 = vrot.slane %v181_v32, 2 }
  0x53   : > { %v174_v34 = vsel %vm173_vm4, %v171_v30, %v172_v31 }
  0x54   : > { %v175_v35 = vrot.slane %v174_v34, 1  ;;  %vm183_vm5 = vcmp.lt.s32.totalorder %v181_v32, %v182_v33 }
  0x55   : > { %v184_v36 = vsel %vm183_vm5, %v181_v32, %v182_v33 }
  0x56   : > { %vm176_vm6 = vcmp.lt.s32.totalorder %v174_v34, %v175_v35  ;;  %v185_v37 = vrot.slane %v184_v36, 1 }
  0x57   : > { %v177_v38 = vsel %vm176_vm6, %v174_v34, %v175_v35 }
  0x58   : > { %vm186_vm7 = vcmp.lt.s32.totalorder %v184_v36, %v185_v37  ;;  %vm188_vm8 = vcmp.eq.s32.totalorder %v158_v12, %v177_v38 }
  0x59   : > { %v187_v39 = vsel %vm186_vm7, %v184_v36, %v185_v37  ;;  %v293_v41 = vsel %vm188_vm8, 1.0, %v451_v40 }
  0x5a   : > { %vm189_vm9 = vcmp.eq.s32.totalorder %v158_v12, %v187_v39 }
  0x5b   : > { %v294_v42 = vsel %vm189_vm9, 1.0, %v451_v40 }
  0x5c   : > { %v196_v43 = vcombine.low %v293_v41, %v294_v42 }
  0x5e   : > { %198 = vst [vmem:[%s132_s17] sm:$0xff] %v196_v43 }
  0x5f   : > { %394 = shalt.err (!%p391_p4)
}
  0x60   : > { %s395_s5 = scalar_lea.hbm %s590_s29, 128  ;;  %s399_s14 = scalar_lea.hbm %s633_s1, 256 }
  0x61   : > { %p396_p5 = scmp.ne.s32.totalorder %s590_s29, %s395_s5  ;;  %p400_p0 = scmp.lt.u32.totalorder %s590_s29, %s633_s1 }
  0x62   : > { %p401_p1 = scmp.lt.u32.totalorder %s399_s14, %s395_s5  ;;  %p403_p6 = scmp.lt.u32.totalorder %s395_s5, %s590_s29 }
  0x63   : > { %p397_p8 = pnand %p396_p5, %p642_p11 }
  0x64   : > { %p402_p3 = por %p401_p1, %p400_p0 }
  0x65   : > { %p398_p9 = pneg %p397_p8 }
  0x66   : > { %p404_p12 = por %p403_p6, %p402_p3 }
  0x68   : > { %p405_p13 = pnand %p404_p12, %p398_p9 }
  0x6a   : > { %408 = shalt.err (!%p405_p13)
}
  0x6b   : > { %304 = dma.vmem_to_hbm [thread:$0]  (%p642_p11), %s585_s25, 128, %s590_s29, %s200_s30  }
  0x6c PF: > { %s226_s21 = sand.u32 1, %s435_s6   ;;  %p643_p7 = scmp.ne.s32.totalorder %s638_s19, 0 }
  0x6d   : > { %p644_p10 = scmp.ge.s32.totalorder %s447_s9, 2  ;;  %s227_s22 = scalar_lea.sflag [#allocation4], %s226_s21 }
  0x6f   : > { %p311_p2 = pnand %p644_p10, %p643_p7 }
  0x71   : > { %430 = dma.done.wait (!%p311_p2), %s227_s22, 128  }
  0x72   : > { %432 = vsyncadd (!%p311_p2), %s227_s22, 4294967168  ;;  %p14_p4 = scmp.ge.s32.totalorder %s488_s12, 4   ;;  %s645_s6 = smov %s439_s7 }
  0x73   : > { %s646_s7 = smov %s443_s8  ;;  %s647_s8 = smov %s500_s15 }
  0x74   : > { %s648_s9 = smov %s488_s12  ;;  %16 = sbr.rel (!%p14_p4) target bundleno = 5 (0x5), region = 69 }
  0x7b   :  { %232 = vsyncpa [#allocation3], 1 }
  0x7c   :  { %234 = vsyncpa [#allocation3 + $0x1], 1 }
  0x7d   :  { %235 = vsyncpa [#allocation4], 1 }
  0x7e   :  { %237 = vsyncpa [#allocation4 + $0x1], 1 }

</bundles_post_ra>
